<compile_context>
chip_gen: v5e
topology: v5e:2x2
jax: 0.10.0
libtpu: 0.0.40
codegen_flags: <defaults>
</compile_context>

<pallas_src>
from typing import NamedTuple

import jax
import jax.numpy as jnp
from jax.experimental import pallas as pl
from jax.experimental.pallas import tpu as pltpu

_MIB = 1024 * 1024


def _round_up(n, m):
    return ((n + m - 1) // m) * m


def _vmem_capacity_bytes():
    # Physical VMEM: 128 MiB on v5e/v6e, 64 MiB on v7x.
    try:
        return int(pltpu.get_tpu_info().vmem_capacity_bytes)
    except Exception:
        return 128 * _MIB


class NonLinearHeadParams(NamedTuple):
    """Padded / pre-cast parameters. Build ONCE with prepare_params()."""
    w1: jax.Array   # (d_in, hid_p)     compute dtype
    b1: jax.Array   # (1, hid_p)        float32
    w2: jax.Array   # (hid_p, d_out_p)  compute dtype
    b2: jax.Array   # (1, d_out_p)      float32
    d_out: int      # unpadded output width


def prepare_params(w1, b1, w2, b2, *, compute_dtype=None):
    """One-time pad + cast of the head weights (hoisted out of the forward path).

    w1: (d_in, hidden), b1: (hidden,), w2: (hidden, d_out), b2: (d_out,).
    compute_dtype is the MXU feed dtype. jnp.bfloat16 is recommended on all TPU
    generations (v5e's MXU is bf16-native too; the epilogue stays f32 on the VPU).
    On v7x, jnp.float8_e4m3fn weights halve resident VMEM again (fp8 MXU).
    """
    if compute_dtype is None:
        compute_dtype = w1.dtype
    d_in, hidden = w1.shape
    d_out = w2.shape[1]
    # Lane padding: hidden / d_out to multiples of 128 (full vregs, lane-dense
    # output stores). d_in is a contraction dim only and needs no padding.
    # TODO(synk): consider 256-multiples for hidden/d_out on v6e/v7x (256-wide MXU).
    hid_p = _round_up(hidden, 128)
    d_out_p = _round_up(d_out, 128)
    # Zero padding is exact: padded hidden units have zero weights and zero bias
    # (ReLU(0)=0 meets zero rows of W2); padded d_out columns are sliced off.
    w1p = jnp.pad(w1, ((0, 0), (0, hid_p - hidden))).astype(compute_dtype)
    w2p = jnp.pad(w2, ((0, hid_p - hidden), (0, d_out_p - d_out))).astype(compute_dtype)
    b1p = jnp.pad(b1, (0, hid_p - hidden)).reshape(1, hid_p).astype(jnp.float32)
    b2p = jnp.pad(b2, (0, d_out_p - d_out)).reshape(1, d_out_p).astype(jnp.float32)
    return NonLinearHeadParams(w1p, b1p, w2p, b2p, d_out)


# ------------------------------- kernels -----------------------------------

def _fused_kernel(x_ref, w1_ref, b1_ref, w2_ref, b2_ref, o_ref):
    # Whole hidden dim resident; ReLU intermediate stays in vregs.
    x = x_ref[...].astype(w1_ref.dtype)                 # in-kernel cast (free under MXU)
    h = jnp.dot(x, w1_ref[...], preferred_element_type=jnp.float32)
    h = jnp.maximum(h + b1_ref[...], 0.0)               # f32 epilogue on the VPU
    y = jnp.dot(h.astype(w2_ref.dtype), w2_ref[...],
                preferred_element_type=jnp.float32)
    o_ref[...] = (y + b2_ref[...]).astype(o_ref.dtype)


def _fused_kernel_staged(x_ref, w1_ref, b1_ref, w2_ref, b2_ref, o_ref, h_ref):
    # Same, but the intermediate is staged through a VMEM scratch when it would
    # not fit in the vreg file (structured spill instead of random regalloc spills).
    x = x_ref[...].astype(w1_ref.dtype)
    h = jnp.dot(x, w1_ref[...], preferred_element_type=jnp.float32)
    h_ref[...] = jnp.maximum(h + b1_ref[...], 0.0).astype(h_ref.dtype)
    y = jnp.dot(h_ref[...], w2_ref[...], preferred_element_type=jnp.float32)
    o_ref[...] = (y + b2_ref[...]).astype(o_ref.dtype)


def _htiled_kernel(x_ref, w1_ref, b1_ref, w2_ref, b2_ref, o_ref, acc_ref):
    # Hidden-axis tiled (grid axis 1, "arbitrary"): y accumulates in f32 VMEM.
    j = pl.program_id(1)

    @pl.when(j == 0)
    def _init():
        acc_ref[...] = jnp.zeros_like(acc_ref)

    x = x_ref[...].astype(w1_ref.dtype)
    h = jnp.dot(x, w1_ref[...], preferred_element_type=jnp.float32)
    h = jnp.maximum(h + b1_ref[...], 0.0)
    acc_ref[...] += jnp.dot(h.astype(w2_ref.dtype), w2_ref[...],
                            preferred_element_type=jnp.float32)

    @pl.when(j == pl.num_programs(1) - 1)
    def _finalize():
        o_ref[...] = (acc_ref[...] + b2_ref[...]).astype(o_ref.dtype)


# ------------------------------- wrapper ------------------------------------

def _pick_tile_m(m, requested):
    t = max(128, _round_up(min(int(requested), max(int(m), 1)), 128))
    # Prefer >= 2 grid steps along the "parallel" M axis when there is enough
    # work, so both of v7x's TensorCores get rows (no effect on 1-TC v5e/v6e).
    if m > 128 and pl.cdiv(m, t) < 2:
        t = max(128, (pl.cdiv(m, 128) + 1) // 2 * 128)
    return t


def _pick_tile_h(hid_p, d_in, d_out_p, itemsize, budget_bytes):
    # Largest 128-multiple divisor of hid_p whose double-buffered W1/W2 slabs fit.
    per_h = 2 * (d_in + d_out_p) * itemsize
    t = max(128, min(hid_p, (budget_bytes // max(per_h, 1)) // 128 * 128))
    while t > 128 and hid_p % t != 0:
        t -= 128
    return t


def nonlinear_head(x, params: NonLinearHeadParams, *, tile_m=256,
                   tile_h=None, force_hidden_tiling=False):
    """Fused Linear -> ReLU -> Linear. x: (..., d_in) -> (..., d_out) in x.dtype."""
    w1, b1, w2, b2, d_out = params
    d_in, hid_p = w1.shape
    d_out_p = w2.shape[1]
    if x.shape[-1] != d_in:
        raise ValueError(f"x last dim {x.shape[-1]} != d_in {d_in}")

    orig_shape = x.shape
    x2d = x.reshape(-1, d_in)            # no pad / no cast in the wrapper
    m = x2d.shape[0]
    tile_m = _pick_tile_m(m, tile_m)
    grid_m = pl.cdiv(m, tile_m)          # partial last row block: OOB reads harmless
                                         # (rows independent), OOB stores masked
    out_struct = jax.ShapeDtypeStruct((m, d_out_p), x.dtype)

    c_itemsize = jnp.dtype(w1.dtype).itemsize
    x_itemsize = jnp.dtype(x.dtype).itemsize
    vmem_cap = _vmem_capacity_bytes()
    weight_bytes = (d_in * hid_p + hid_p * d_out_p) * c_itemsize
    bias_bytes = (hid_p + d_out_p) * 4

    # Full weight residency only while it fits the VMEM budget; otherwise tile the
    # hidden axis with an f32 accumulator (matters on v7x's 64 MiB VMEM).
    resident_ok = (weight_bytes + bias_bytes) <= int(0.55 * vmem_cap)
    use_htiling = force_hidden_tiling or not resident_ok

    if not use_htiling:
        # Skip the VMEM staging of h when the f32 intermediate fits ~half the vregs.
        stage_hidden = tile_m * hid_p * 4 > 128 * 1024
        kernel = _fused_kernel_staged if stage_hidden else _fused_kernel
        scratch = [pltpu.VMEM((tile_m, hid_p), w1.dtype)] if stage_hidden else []

        footprint = (2 * weight_bytes + 2 * bias_bytes            # worst case: 2 buffers
                     + 2 * tile_m * d_in * x_itemsize
                     + 2 * tile_m * d_out_p * x_itemsize
                     + (tile_m * hid_p * c_itemsize if stage_hidden else 0))
        vmem_limit = int(min(0.85 * vmem_cap,
                             max(32 * _MIB, 1.5 * footprint + 4 * _MIB)))

        def run(single_buffer_weights):
            if single_buffer_weights:
                # Grid-invariant operands never need a prefetch buffer: single
                # buffer halves resident-weight VMEM vs. default double buffering.
                def const_spec(shape):
                    return pl.BlockSpec(shape, lambda i: (0,) * len(shape),
                                        pipeline_mode=pl.Buffered(1))
            else:
                def const_spec(shape):
                    return pl.BlockSpec(shape, lambda i: (0,) * len(shape))

            return pl.pallas_call(
                kernel,
                out_shape=out_struct,
                grid_spec=pltpu.PrefetchScalarGridSpec(
                    num_scalar_prefetch=0,
                    grid=(grid_m,),
                    in_specs=[
                        pl.BlockSpec((tile_m, d_in), lambda i: (i, 0)),   # x row tile
                        const_spec((d_in, hid_p)),                        # W1 (resident)
                        const_spec((1, hid_p)),                           # b1 (f32)
                        const_spec((hid_p, d_out_p)),                     # W2 (resident)
                        const_spec((1, d_out_p)),                         # b2 (f32)
                    ],
                    out_specs=pl.BlockSpec((tile_m, d_out_p), lambda i: (i, 0)),
                    scratch_shapes=scratch,
                ),
                compiler_params=pltpu.CompilerParams(
                    dimension_semantics=("parallel",),
                    vmem_limit_bytes=vmem_limit),
            )(x2d, w1, b1, w2, b2)

        try:
            out = run(True)
        except Exception:
            # Pallas build without pipeline_mode / Buffered(1) support: fall back
            # to default double-buffered resident weights (correctness identical).
            out = run(False)
    else:
        weight_budget = int(0.45 * vmem_cap)
        th = tile_h if tile_h is not None else _pick_tile_h(
            hid_p, d_in, d_out_p, c_itemsize, weight_budget)
        th = max(128, min(int(th), hid_p))
        while th > 128 and hid_p % th != 0:
            th -= 128          # keep the hidden grid exact (no garbage weight cols)
        grid_h = hid_p // th

        footprint = (2 * (d_in * th + th * d_out_p) * c_itemsize
                     + 2 * (th + d_out_p) * 4
                     + 2 * tile_m * d_in * x_itemsize
                     + 2 * tile_m * d_out_p * x_itemsize
                     + tile_m * d_out_p * 4)
        vmem_limit = int(min(0.85 * vmem_cap,
                             max(32 * _MIB, 1.5 * footprint + 4 * _MIB)))

        out = pl.pallas_call(
            _htiled_kernel,
            out_shape=out_struct,
            grid_spec=pltpu.PrefetchScalarGridSpec(
                num_scalar_prefetch=0,
                grid=(grid_m, grid_h),
                in_specs=[
                    pl.BlockSpec((tile_m, d_in), lambda i, j: (i, 0)),   # x (revisited)
                    pl.BlockSpec((d_in, th), lambda i, j: (0, j)),       # W1 col slab
                    pl.BlockSpec((1, th), lambda i, j: (0, j)),          # b1 slab
                    pl.BlockSpec((th, d_out_p), lambda i, j: (j, 0)),    # W2 row slab
                    pl.BlockSpec((1, d_out_p), lambda i, j: (0, 0)),     # b2
                ],
                out_specs=pl.BlockSpec((tile_m, d_out_p), lambda i, j: (i, 0)),
                scratch_shapes=[pltpu.VMEM((tile_m, d_out_p), jnp.float32)],
            ),
            compiler_params=pltpu.CompilerParams(
                dimension_semantics=("parallel", "arbitrary"),
                vmem_limit_bytes=vmem_limit),
        )(x2d, w1, b1, w2, b2)

    if d_out_p != d_out:
        out = out[:, :d_out]
    return out.reshape(*orig_shape[:-1], d_out)


# ------------------------------- reference / demo ---------------------------

def init_params(key, input_dim, out_dim, hidden=None, dtype=jnp.float32):
    """Deterministic init mirroring nn.Linear; returns W pre-transposed to (in, out)."""
    hidden = input_dim if not hidden else hidden
    k1, k2, k3, k4 = jax.random.split(key, 4)
    bound1 = 1.0 / (input_dim ** 0.5)
    bound2 = 1.0 / (hidden ** 0.5)
    w1_t = jax.random.uniform(k1, (hidden, input_dim), dtype, -bound1, bound1)
    b1 = jax.random.uniform(k2, (hidden,), dtype, -bound1, bound1)
    w2_t = jax.random.uniform(k3, (out_dim, hidden), dtype, -bound2, bound2)
    b2 = jax.random.uniform(k4, (out_dim,), dtype, -bound2, bound2)
    return w1_t.T, b1, w2_t.T, b2


def reference(x, w1, b1, w2, b2):
    h = jnp.maximum(x @ w1 + b1, 0.0)
    return h @ w2 + b2


if __name__ == "__main__":
    key = jax.random.PRNGKey(0)
    kx, kp, kx2, kp2 = jax.random.split(key, 4)

    # Small shapes consistent with the module: x (batch, seq, input_dim).
    batch, seq, input_dim, hidden, out_dim = 2, 8, 32, 32, 16
    x = jax.random.normal(kx, (batch, seq, input_dim), jnp.float32)
    w1, b1, w2, b2 = init_params(kp, input_dim, out_dim, hidden)
    y_ref = reference(x, w1, b1, w2, b2)

    # f32 MXU feed (exact semantics of the PyTorch module).
    p_f32 = prepare_params(w1, b1, w2, b2)                       # one-time pad/cast
    y = jax.block_until_ready(nonlinear_head(x, p_f32))
    assert y.shape == (batch, seq, out_dim)
    assert jnp.allclose(y, y_ref, atol=1e-5, rtol=1e-5)

    # bf16 MXU feed (recommended on v5e/v6e/v7x): f32 accumulation + f32 epilogue.
    p_bf16 = prepare_params(w1, b1, w2, b2, compute_dtype=jnp.bfloat16)
    y_bf16 = jax.block_until_ready(nonlinear_head(x, p_bf16))
    assert y_bf16.shape == (batch, seq, out_dim)
    assert jnp.allclose(y_bf16, y_ref, atol=1e-1, rtol=1e-1)

    # Multi-step "parallel" M grid (keeps both v7x cores busy) + masked partial block.
    m2 = 272
    x2 = jax.random.normal(kx2, (m2, input_dim), jnp.float32)
    y2 = jax.block_until_ready(nonlinear_head(x2, p_f32))
    assert y2.shape == (m2, out_dim)
    assert jnp.allclose(y2, reference(x2, w1, b1, w2, b2), atol=1e-5, rtol=1e-5)

    # Hidden-axis-tiled path (the v7x large-weight fallback), forced at small size.
    hidden_big = 256
    w1b, b1b, w2b, b2b = init_params(kp2, input_dim, out_dim, hidden_big)
    p_big = prepare_params(w1b, b1b, w2b, b2b)
    y3 = jax.block_until_ready(
        nonlinear_head(x, p_big, force_hidden_tiling=True, tile_h=128))
    assert y3.shape == (batch, seq, out_dim)
    assert jnp.allclose(y3, reference(x, w1b, b1b, w2b, b2b), atol=1e-4, rtol=1e-4)

    print("KERNEL_OK")
</pallas_src>

<mosaic_0001>
module attributes {stable_mosaic.version = 11 : i64} {
  func.func @_fused_kernel(%arg0: i32, %arg1: memref<128x32xf32, #tpu.memory_space<vmem>>, %arg2: memref<32x128xf32, #tpu.memory_space<vmem>>, %arg3: memref<1x128xf32, #tpu.memory_space<vmem>>, %arg4: memref<128x128xf32, #tpu.memory_space<vmem>>, %arg5: memref<1x128xf32, #tpu.memory_space<vmem>>, %arg6: memref<128x128xf32, #tpu.memory_space<vmem>>) attributes {dimension_semantics = [#tpu.dimension_semantics<parallel>], iteration_bounds = array<i64: 1>, scalar_prefetch = 0 : i64, scratch_operands = 0 : i64, tpu.core_type = #tpu.core_type<tc>, window_params = [{transform_indices = @transform_0, window_bounds = array<i64: 128, 32>}, {pipeline_mode = #tpu.pipeline_mode<synchronous>, transform_indices = @transform_1, window_bounds = array<i64: 32, 128>}, {pipeline_mode = #tpu.pipeline_mode<synchronous>, transform_indices = @transform_2, window_bounds = array<i64: 1, 128>}, {pipeline_mode = #tpu.pipeline_mode<synchronous>, transform_indices = @transform_3, window_bounds = array<i64: 128, 128>}, {pipeline_mode = #tpu.pipeline_mode<synchronous>, transform_indices = @transform_4, window_bounds = array<i64: 1, 128>}, {transform_indices = @transform_5, window_bounds = array<i64: 128, 128>}]} {
    %c0 = arith.constant 0 : index
    %c0_0 = arith.constant 0 : index
    %0 = vector.load %arg1[%c0, %c0_0] : memref<128x32xf32, #tpu.memory_space<vmem>>, vector<128x32xf32>
    %c0_1 = arith.constant 0 : index
    %c0_2 = arith.constant 0 : index
    %1 = vector.load %arg2[%c0_1, %c0_2] : memref<32x128xf32, #tpu.memory_space<vmem>>, vector<32x128xf32>
    %cst = arith.constant dense<0.000000e+00> : vector<128x128xf32>
    %2 = tpu.matmul %0, %1, %cst {dimension_numbers = #tpu.dot_dimension_numbers<[1], [0], [0], [1], [0, 0, 1, 1], [], []>} : vector<128x32xf32>, vector<32x128xf32>, vector<128x128xf32> -> vector<128x128xf32>
    %c0_3 = arith.constant 0 : index
    %c0_4 = arith.constant 0 : index
    %3 = vector.load %arg3[%c0_3, %c0_4] : memref<1x128xf32, #tpu.memory_space<vmem>>, vector<1x128xf32>
    %4 = vector.broadcast %3 : vector<1x128xf32> to vector<128x128xf32>
    %5 = arith.addf %2, %4 : vector<128x128xf32>
    %cst_5 = arith.constant 0.000000e+00 : f32
    %6 = vector.broadcast %cst_5 : f32 to vector<128x128xf32>
    %7 = arith.maximumf %5, %6 : vector<128x128xf32>
    %c0_6 = arith.constant 0 : index
    %c0_7 = arith.constant 0 : index
    %8 = vector.load %arg4[%c0_6, %c0_7] : memref<128x128xf32, #tpu.memory_space<vmem>>, vector<128x128xf32>
    %cst_8 = arith.constant dense<0.000000e+00> : vector<128x128xf32>
    %9 = tpu.matmul %7, %8, %cst_8 {dimension_numbers = #tpu.dot_dimension_numbers<[1], [0], [0], [1], [0, 0, 1, 1], [], []>} : vector<128x128xf32>, vector<128x128xf32>, vector<128x128xf32> -> vector<128x128xf32>
    %c0_9 = arith.constant 0 : index
    %c0_10 = arith.constant 0 : index
    %10 = vector.load %arg5[%c0_9, %c0_10] : memref<1x128xf32, #tpu.memory_space<vmem>>, vector<1x128xf32>
    %11 = vector.broadcast %10 : vector<1x128xf32> to vector<128x128xf32>
    %12 = arith.addf %9, %11 : vector<128x128xf32>
    %c0_11 = arith.constant 0 : index
    %c0_12 = arith.constant 0 : index
    %13 = vector.load %arg6[%c0_11, %c0_12] : memref<128x128xf32, #tpu.memory_space<vmem>>, vector<128x128xf32>
    tpu.vector_store %arg6[%c0_11, %c0_12], %12 {strides = array<i32>} : memref<128x128xf32, #tpu.memory_space<vmem>>, vector<128x128xf32>,
    return
  }
  func.func @transform_0(%arg0: i32) -> (i32, i32) {
    %c0_i32 = arith.constant 0 : i32
    %c0_i32_0 = arith.constant 0 : i32
    return %arg0, %c0_i32 : i32, i32
  }
  func.func @transform_1(%arg0: i32) -> (i32, i32) {
    %c0_i32 = arith.constant 0 : i32
    %c0_i32_0 = arith.constant 0 : i32
    %c0_i32_1 = arith.constant 0 : i32
    return %c0_i32, %c0_i32_0 : i32, i32
  }
  func.func @transform_2(%arg0: i32) -> (i32, i32) {
    %c0_i32 = arith.constant 0 : i32
    %c0_i32_0 = arith.constant 0 : i32
    %c0_i32_1 = arith.constant 0 : i32
    return %c0_i32, %c0_i32_0 : i32, i32
  }
  func.func @transform_3(%arg0: i32) -> (i32, i32) {
    %c0_i32 = arith.constant 0 : i32
    %c0_i32_0 = arith.constant 0 : i32
    %c0_i32_1 = arith.constant 0 : i32
    return %c0_i32, %c0_i32_0 : i32, i32
  }
  func.func @transform_4(%arg0: i32) -> (i32, i32) {
    %c0_i32 = arith.constant 0 : i32
    %c0_i32_0 = arith.constant 0 : i32
    %c0_i32_1 = arith.constant 0 : i32
    return %c0_i32, %c0_i32_0 : i32, i32
  }
  func.func @transform_5(%arg0: i32) -> (i32, i32) {
    %c0_i32 = arith.constant 0 : i32
    %c0_i32_0 = arith.constant 0 : i32
    return %arg0, %c0_i32 : i32, i32
  }
}

module attributes {stable_mosaic.version = 11 : i64} {
  func.func @_fused_kernel(%arg0: i32, %arg1: memref<128x32xf32, #tpu.memory_space<vmem>>, %arg2: memref<32x128xf32, #tpu.memory_space<vmem>>, %arg3: memref<1x128xf32, #tpu.memory_space<vmem>>, %arg4: memref<128x128xf32, #tpu.memory_space<vmem>>, %arg5: memref<1x128xf32, #tpu.memory_space<vmem>>, %arg6: memref<128x128xf32, #tpu.memory_space<vmem>>) attributes {dimension_semantics = [#tpu.dimension_semantics<parallel>], iteration_bounds = array<i64: 1>, scalar_prefetch = 0 : i64, scratch_operands = 0 : i64, tpu.core_type = #tpu.core_type<tc>, window_params = [{transform_indices = @transform_0, window_bounds = array<i64: 128, 32>}, {pipeline_mode = #tpu.pipeline_mode<synchronous>, transform_indices = @transform_1, window_bounds = array<i64: 32, 128>}, {pipeline_mode = #tpu.pipeline_mode<synchronous>, transform_indices = @transform_2, window_bounds = array<i64: 1, 128>}, {pipeline_mode = #tpu.pipeline_mode<synchronous>, transform_indices = @transform_3, window_bounds = array<i64: 128, 128>}, {pipeline_mode = #tpu.pipeline_mode<synchronous>, transform_indices = @transform_4, window_bounds = array<i64: 1, 128>}, {transform_indices = @transform_5, window_bounds = array<i64: 128, 128>}]} {
    %c0 = arith.constant 0 : index
    %c0_0 = arith.constant 0 : index
    %0 = vector.load %arg1[%c0, %c0_0] : memref<128x32xf32, #tpu.memory_space<vmem>>, vector<128x32xf32>
    %c0_1 = arith.constant 0 : index
    %c0_2 = arith.constant 0 : index
    %1 = vector.load %arg2[%c0_1, %c0_2] : memref<32x128xf32, #tpu.memory_space<vmem>>, vector<32x128xf32>
    %cst = arith.constant dense<0.000000e+00> : vector<128x128xf32>
    %2 = tpu.matmul %0, %1, %cst {dimension_numbers = #tpu.dot_dimension_numbers<[1], [0], [0], [1], [0, 0, 1, 1], [], []>} : vector<128x32xf32>, vector<32x128xf32>, vector<128x128xf32> -> vector<128x128xf32>
    %c0_3 = arith.constant 0 : index
    %c0_4 = arith.constant 0 : index
    %3 = vector.load %arg3[%c0_3, %c0_4] : memref<1x128xf32, #tpu.memory_space<vmem>>, vector<1x128xf32>
    %4 = vector.broadcast %3 : vector<1x128xf32> to vector<128x128xf32>
    %5 = arith.addf %2, %4 : vector<128x128xf32>
    %cst_5 = arith.constant 0.000000e+00 : f32
    %6 = vector.broadcast %cst_5 : f32 to vector<128x128xf32>
    %7 = arith.maximumf %5, %6 : vector<128x128xf32>
    %c0_6 = arith.constant 0 : index
    %c0_7 = arith.constant 0 : index
    %8 = vector.load %arg4[%c0_6, %c0_7] : memref<128x128xf32, #tpu.memory_space<vmem>>, vector<128x128xf32>
    %cst_8 = arith.constant dense<0.000000e+00> : vector<128x128xf32>
    %9 = tpu.matmul %7, %8, %cst_8 {dimension_numbers = #tpu.dot_dimension_numbers<[1], [0], [0], [1], [0, 0, 1, 1], [], []>} : vector<128x128xf32>, vector<128x128xf32>, vector<128x128xf32> -> vector<128x128xf32>
    %c0_9 = arith.constant 0 : index
    %c0_10 = arith.constant 0 : index
    %10 = vector.load %arg5[%c0_9, %c0_10] : memref<1x128xf32, #tpu.memory_space<vmem>>, vector<1x128xf32>
    %11 = vector.broadcast %10 : vector<1x128xf32> to vector<128x128xf32>
    %12 = arith.addf %9, %11 : vector<128x128xf32>
    %c0_11 = arith.constant 0 : index
    %c0_12 = arith.constant 0 : index
    %13 = vector.load %arg6[%c0_11, %c0_12] : memref<128x128xf32, #tpu.memory_space<vmem>>, vector<128x128xf32>
    tpu.vector_store %arg6[%c0_11, %c0_12], %12 {strides = array<i32>} : memref<128x128xf32, #tpu.memory_space<vmem>>, vector<128x128xf32>,
    return
  }
  func.func @transform_0(%arg0: i32) -> (i32, i32) {
    %c0_i32 = arith.constant 0 : i32
    %c0_i32_0 = arith.constant 0 : i32
    return %arg0, %c0_i32 : i32, i32
  }
  func.func @transform_1(%arg0: i32) -> (i32, i32) {
    %c0_i32 = arith.constant 0 : i32
    %c0_i32_0 = arith.constant 0 : i32
    %c0_i32_1 = arith.constant 0 : i32
    return %c0_i32, %c0_i32_0 : i32, i32
  }
  func.func @transform_2(%arg0: i32) -> (i32, i32) {
    %c0_i32 = arith.constant 0 : i32
    %c0_i32_0 = arith.constant 0 : i32
    %c0_i32_1 = arith.constant 0 : i32
    return %c0_i32, %c0_i32_0 : i32, i32
  }
  func.func @transform_3(%arg0: i32) -> (i32, i32) {
    %c0_i32 = arith.constant 0 : i32
    %c0_i32_0 = arith.constant 0 : i32
    %c0_i32_1 = arith.constant 0 : i32
    return %c0_i32, %c0_i32_0 : i32, i32
  }
  func.func @transform_4(%arg0: i32) -> (i32, i32) {
    %c0_i32 = arith.constant 0 : i32
    %c0_i32_0 = arith.constant 0 : i32
    %c0_i32_1 = arith.constant 0 : i32
    return %c0_i32, %c0_i32_0 : i32, i32
  }
  func.func @transform_5(%arg0: i32) -> (i32, i32) {
    %c0_i32 = arith.constant 0 : i32
    %c0_i32_0 = arith.constant 0 : i32
    return %arg0, %c0_i32 : i32, i32
  }
}

</mosaic_0001>

<bundles_post_ra>
// kernel: tpu_custom_call.1
= control target key start
LH: loop header
LB: loop body
LE: loop exit
PB: predicated region body
PF: predicated region fallthrough
CT: control target
= control target key end

     0   :  { %10 = vsyncpa [#allocation3], 0  ;;  %s587_s0 = inlined_call_operand.hbm [shape: f32[16,32], index: 0, kind: input, shape index: {}]   ;;  %s588_s1 = inlined_call_operand.hbm [shape: f32[32,128], index: 1, kind: input, shape index: {}]   ;;  %s589_s2 = inlined_call_operand.vmem [shape: f32[1,128], index: 2, kind: input, shape index: {}]   ;;  %s590_s3 = inlined_call_operand.hbm [shape: f32[128,128], index: 3, kind: input, shape index: {}]   ;;  %s591_s4 = inlined_call_operand.vmem [shape: f32[1,128], index: 4, kind: input, shape index: {}]   ;;  %s592_s5 = inlined_call_operand.hbm [shape: f32[16,128], index: 5, kind: output, shape index: {}]  }
   0x1   :  { %11 = vsyncpa [#allocation6], 0 }
   0x2   :  { %12 = vsyncpa [#allocation4], 0 }
   0x3   :  { %16 = vsyncadd [#allocation3], 1792  ;;  %s30_s20 = sshll.u32 %s588_s1, 4  ;;  %s505_s21 = smov [#allocation5]   ;;  %s31_s20 = int_to_ptr.hbm [resolvable:$true] %s30_s20 }
   0x4   :  { %s32_s22 = sshll.u32 %s505_s21, 4  ;;  %s17_s25 = sshll.u32 %s587_s0, 4  ;;  %s33_s22 = int_to_ptr.vmem [resolvable:$true] %s32_s22  ;;  %s18_s25 = int_to_ptr.hbm [resolvable:$true] %s17_s25 }
   0x5   :  { %s506_s26 = smov 128   ;;  %s507_s27 = smov 8  }
   0x6   :  { %38 = dma.hbm_to_vmem [thread:$0]  %s31_s20, 512, %s33_s22, [#allocation6], %s506_s26, %s506_s26, %s507_s27  }
   0x7   :  { %s508_s28 = smov [#allocation2]   ;;  %s45_s1 = sshll.u32 %s590_s3, 4  ;;  %s46_s1 = int_to_ptr.hbm [resolvable:$true] %s45_s1 }
   0x8   :  { %s19_s29 = sshll.u32 %s508_s28, 4  ;;  %s509_s0 = smov [#allocation7]   ;;  %s20_s29 = int_to_ptr.vmem [resolvable:$true] %s19_s29 }
   0x9   :  { %25 = dma.hbm_to_vmem [thread:$0]  %s18_s25, 256, %s20_s29, [#allocation3], %s506_s26, %s506_s26, %s507_s27  }
   0xa   :  { %s47_s7 = sshll.u32 %s509_s0, 4  ;;  %s48_s7 = int_to_ptr.vmem [resolvable:$true] %s47_s7 }
   0xb   :  { %53 = dma.hbm_to_vmem [thread:$0]  %s46_s1, 2048, %s48_s7, [#allocation6], %s506_s26, %s506_s26, %s507_s27  }
   0xc   :  { %499 = dma.done.wait [#allocation3], 2048  }
   0xd   :  { %500 = vsyncadd [#allocation3], 4294965248 }
   0xe   :  { %501 = dma.done.wait [#allocation6], 2560  }
   0xf   :  { %502 = vsyncadd [#allocation6], 4294964736  ;;  %v87_v0 = vld [vmem:[#allocation5 + $0x18] sm:$0xff]  ;;  %v86_v1 = vld [vmem:[#allocation5 + $0x10] sm:$0xff]  ;;  %vm92_vm0 = vcmask 261120  }
  0x10   :  { %153 = vmatpush.msra.mxu0 %v87_v0  ;;  %359 = vmatpush.msra.mxu3 %v87_v0  ;;  %v85_v2 = vld [vmem:[#allocation5 + $0x8] sm:$0xff]  ;;  %v84_v3 = vld [vmem:[#allocation5] sm:$0xff]  ;;  %v70_v6 = vld [vmem:[#allocation2 + $0x10] sm:$0xff] }
  0x11   :  { %v68_v4 = vld [vmem:[#allocation2] sm:$0xff]  ;;  %v69_v5 = vld [vmem:[#allocation2 + $0x8] sm:$0xff]  ;;  %v71_v7 = vld [vmem:[#allocation2 + $0x18] sm:$0xff] }
  0x12   :  { %154 = vmatpush.msra.mxu0 %v86_v1  ;;  %360 = vmatpush.msra.mxu3 %v86_v1  ;;  %v78_v8 = vld [vmem:[#allocation2 + $0x50] sm:$0xff]  ;;  %v72_v9 = vld [vmem:[#allocation2 + $0x20] sm:$0xff]  ;;  %v79_v10 = vld [vmem:[#allocation2 + $0x58] sm:$0xff] }
  0x13   :  { %v73_v11 = vld [vmem:[#allocation2 + $0x28] sm:$0xff]  ;;  %v80_v12 = vld [vmem:[#allocation2 + $0x60] sm:$0xff]  ;;  %v237_v13 = vld [vmem:[#allocation7 + $0x78] sm:$0xff] }
  0x14   :  { %155 = vmatpush.msra.mxu0 %v85_v2  ;;  %361 = vmatpush.msra.mxu3 %v85_v2  ;;  %v236_v14 = vld [vmem:[#allocation7 + $0x70] sm:$0xff]  ;;  %v235_v15 = vld [vmem:[#allocation7 + $0x68] sm:$0xff]  ;;  %v234_v17 = vld [vmem:[#allocation7 + $0x60] sm:$0xff] }
  0x15   :  { %242 = vmatpush.msra.mxu1 %v237_v13  ;;  %363 = vmatpush.msra.mxu2 %v237_v13  ;;  %v74_v16 = vld [vmem:[#allocation2 + $0x30] sm:$0xff]  ;;  %v81_v18 = vld [vmem:[#allocation2 + $0x68] sm:$0xff]  ;;  %v233_v19 = vld [vmem:[#allocation7 + $0x58] sm:$0xff] }
  0x16   :  { %156 = vmatpush.msra.mxu0 %v84_v3  ;;  %362 = vmatpush.msra.mxu3 %v84_v3  ;;  %v232_v20 = vld [vmem:[#allocation7 + $0x50] sm:$0xff]  ;;  %v231_v21 = vld [vmem:[#allocation7 + $0x48] sm:$0xff]  ;;  %v75_v22 = vld [vmem:[#allocation2 + $0x38] sm:$0xff] }
  0x17   :  { %343 = vmatmul.msk.f32.vlgmr.msra.gmra.mxu0 %vm92_vm0, %v68_v4  ;;  %353 = vmatmul.msk.f32.vlgmr.msra.gmra.mxu3 %vm92_vm0, %v78_v8  ;;  %v230_v23 = vld [vmem:[#allocation7 + $0x40] sm:$0xff]  ;;  %v82_v24 = vld [vmem:[#allocation2 + $0x70] sm:$0xff]  ;;  %v229_v25 = vld [vmem:[#allocation7 + $0x38] sm:$0xff] }
  0x18   :  { %364 = vmatpush.msrb.mxu3 %v237_v13  ;;  %243 = vmatpush.msra.mxu1 %v236_v14  ;;  %v228_v26 = vld [vmem:[#allocation7 + $0x30] sm:$0xff]  ;;  %v227_v27 = vld [vmem:[#allocation7 + $0x28] sm:$0xff]  ;;  %v76_v28 = vld [vmem:[#allocation2 + $0x40] sm:$0xff] }
  0x19   :  { %365 = vmatpush.msra.mxu2 %v236_v14  ;;  %v226_v29 = vld [vmem:[#allocation7 + $0x20] sm:$0xff]  ;;  %v83_v30 = vld [vmem:[#allocation2 + $0x78] sm:$0xff]  ;;  %v77_v32 = vld [vmem:[#allocation2 + $0x48] sm:$0xff] }
  0x1a   :  { %366 = vmatpush.msrb.mxu3 %v236_v14  ;;  %244 = vmatpush.msra.mxu1 %v235_v15  ;;  %v225_v31 = vld [vmem:[#allocation7 + $0x18] sm:$0xff]  ;;  %v224_v33 = vld [vmem:[#allocation7 + $0x10] sm:$0xff]  ;;  %v223_v34 = vld [vmem:[#allocation7 + $0x8] sm:$0xff] }
  0x1b   :  { %367 = vmatpush.msra.mxu2 %v235_v15  ;;  %v222_v35 = vld [vmem:[#allocation7] sm:$0xff] }
  0x1c   :  { %368 = vmatpush.msrb.mxu3 %v235_v15  ;;  %245 = vmatpush.msra.mxu1 %v234_v17  ;;  %v401_v36 = vld [vmem:[%s589_s2] ss:$0 sm:$0xff] }
  0x1d   :  { %369 = vmatpush.msra.mxu2 %v234_v17 }
  0x1e   :  { %246 = vmatpush.msra.mxu1 %v233_v19  ;;  %370 = vmatpush.msrb.mxu3 %v234_v17 }
  0x1f   :  { %344 = vmatmul.msk.f32.gmra.mxu0 %vm92_vm0, %v69_v5  ;;  %354 = vmatmul.msk.f32.gmra.mxu3 %vm92_vm0, %v79_v10 }
  0x20   :  { %371 = vmatpush.msra.mxu2 %v233_v19  ;;  %247 = vmatpush.msra.mxu1 %v232_v20 }
  0x21   :  { %372 = vmatpush.msrb.mxu3 %v233_v19 }
  0x22   :  { %373 = vmatpush.msra.mxu2 %v232_v20  ;;  %248 = vmatpush.msra.mxu1 %v231_v21 }
  0x23   :  { %374 = vmatpush.msrb.mxu3 %v232_v20 }
  0x24   :  { %375 = vmatpush.msra.mxu2 %v231_v21  ;;  %249 = vmatpush.msra.mxu1 %v230_v23 }
  0x25   :  { %376 = vmatpush.msrb.mxu3 %v231_v21  ;;  %v402_v21 = vld [vmem:[%s591_s4] ss:$0 sm:$0xff] }
  0x26   :  { %377 = vmatpush.msra.mxu2 %v230_v23  ;;  %250 = vmatpush.msra.mxu1 %v229_v25 }
  0x27   :  { %345 = vmatmul.msk.f32.gmra.mxu0 %vm92_vm0, %v70_v6  ;;  %355 = vmatmul.msk.f32.gmra.mxu3 %vm92_vm0, %v80_v12 }
  0x28   :  { %379 = vmatpush.msra.mxu2 %v229_v25  ;;  %251 = vmatpush.msra.mxu1 %v228_v26 }
  0x29   :  { %378 = vmatpush.msrb.mxu3 %v230_v23 }
  0x2a   :  { %381 = vmatpush.msra.mxu2 %v228_v26  ;;  %252 = vmatpush.msra.mxu1 %v227_v27 }
  0x2b   :  { %380 = vmatpush.msrb.mxu3 %v229_v25 }
  0x2c   :  { %383 = vmatpush.msra.mxu2 %v227_v27  ;;  %253 = vmatpush.msra.mxu1 %v226_v29 }
  0x2d   :  { %382 = vmatpush.msrb.mxu3 %v228_v26 }
  0x2e   :  { %385 = vmatpush.msra.mxu2 %v226_v29  ;;  %254 = vmatpush.msra.mxu1 %v225_v31 }
  0x2f   :  { %346 = vmatmul.msk.f32.gmra.mxu0 %vm92_vm0, %v71_v7  ;;  %356 = vmatmul.msk.f32.gmra.mxu3 %vm92_vm0, %v81_v18 }
  0x30   :  { %387 = vmatpush.msra.mxu2 %v225_v31  ;;  %384 = vmatpush.msrb.mxu3 %v227_v27 }
  0x31   :  { %255 = vmatpush.msra.mxu1 %v224_v33 }
  0x32   :  { %386 = vmatpush.msrb.mxu3 %v226_v29  ;;  %389 = vmatpush.msra.mxu2 %v224_v33 }
  0x33   :  { %256 = vmatpush.msra.mxu1 %v223_v34 }
  0x34   :  { %388 = vmatpush.msrb.mxu3 %v225_v31  ;;  %391 = vmatpush.msra.mxu2 %v223_v34 }
  0x35   :  { %257 = vmatpush.msra.mxu1 %v222_v35 }
  0x36   :  { %390 = vmatpush.msrb.mxu3 %v224_v33  ;;  %393 = vmatpush.msra.mxu2 %v222_v35 }
  0x37   :  { %347 = vmatmul.msk.f32.gmra.mxu0 %vm92_vm0, %v72_v9  ;;  %357 = vmatmul.msk.f32.gmra.mxu3 %vm92_vm0, %v82_v24 }
  0x38   :  { %392 = vmatpush.msrb.mxu3 %v223_v34 }
  0x3a   :  { %394 = vmatpush.msrb.mxu3 %v222_v35 }
  0x3f   :  { %348 = vmatmul.msk.f32.gmra.mxu0 %vm92_vm0, %v73_v11  ;;  %358 = vmatmul.msk.f32.gmra.mxu3 %vm92_vm0, %v83_v30 }
  0x47   :  { %349 = vmatmul.msk.f32.gmra.mxu0 %vm92_vm0, %v74_v16 }
  0x4f   :  { %350 = vmatmul.msk.f32.gmra.mxu0 %vm92_vm0, %v75_v22 }
  0x57   :  { %351 = vmatmul.msk.f32.gmra.mxu0 %vm92_vm0, %v76_v28 }
  0x5f   :  { %352 = vmatmul.msk.f32.gmra.mxu0 %vm92_vm0, %v77_v32 }
  0x94   :  { %v158_v37 = vpop.f32.mrf.mxu0 }
  0x95   :  { %v159_v38 = vadd.f32 %v401_v36, %v158_v37 }
  0x97   :  { %v206_v39 = vmax.f32 %v159_v38, 0.0 }
  0x99   :  { %258 = vmatmul.f32.vlgmr.msra.gmra.mxu1 %v206_v39 }
  0x9a   :  { %v188_v50 = vpop.f32.mrf.mxu3 }
  0x9b   :  { %v189_v13 = vadd.f32 %v401_v36, %v188_v50 }
  0x9c   :  { %v161_v40 = vpop.f32.mrf.mxu0 }
  0x9d   :  { %v162_v41 = vadd.f32 %v401_v36, %v161_v40  ;;  %v216_v14 = vmax.f32 %v189_v13, 0.0 }
  0x9f   :  { %v207_v42 = vmax.f32 %v162_v41, 0.0 }
  0xa1   :  { %261 = vmatmul.f32.gmra.mxu1 %v207_v42 }
  0xa2   :  { %v191_v54 = vpop.f32.mrf.mxu3 }
  0xa3   :  { %v192_v15 = vadd.f32 %v401_v36, %v191_v54 }
  0xa4   :  { %v164_v43 = vpop.f32.mrf.mxu0 }
  0xa5   :  { %v165_v44 = vadd.f32 %v401_v36, %v164_v43  ;;  %v217_v16 = vmax.f32 %v192_v15, 0.0 }
  0xa7   :  { %v208_v45 = vmax.f32 %v165_v44, 0.0 }
  0xa9   :  { %264 = vmatmul.f32.gmra.mxu1 %v208_v45 }
  0xaa   :  { %v194_v58 = vpop.f32.mrf.mxu3 }
  0xab   :  { %v195_v17 = vadd.f32 %v401_v36, %v194_v58 }
  0xac   :  { %v167_v46 = vpop.f32.mrf.mxu0 }
  0xad   :  { %v168_v47 = vadd.f32 %v401_v36, %v167_v46  ;;  %v218_v18 = vmax.f32 %v195_v17, 0.0 }
  0xaf   :  { %v209_v48 = vmax.f32 %v168_v47, 0.0 }
  0xb1   :  { %267 = vmatmul.f32.gmra.mxu1 %v209_v48 }
  0xb2   :  { %v197_v62 = vpop.f32.mrf.mxu3 }
  0xb3   :  { %v198_v19 = vadd.f32 %v401_v36, %v197_v62 }
  0xb4   :  { %v170_v49 = vpop.f32.mrf.mxu0 }
  0xb5   :  { %v171_v51 = vadd.f32 %v401_v36, %v170_v49  ;;  %v219_v20 = vmax.f32 %v198_v19, 0.0 }
  0xb7   :  { %v210_v52 = vmax.f32 %v171_v51, 0.0 }
  0xb9   :  { %270 = vmatmul.f32.gmra.mxu1 %v210_v52 }
  0xba   :  { %v200_v2 = vpop.f32.mrf.mxu3 }
  0xbb   :  { %v201_v4 = vadd.f32 %v401_v36, %v200_v2 }
  0xbc   :  { %v173_v53 = vpop.f32.mrf.mxu0 }
  0xbd   :  { %v174_v55 = vadd.f32 %v401_v36, %v173_v53  ;;  %v220_v6 = vmax.f32 %v201_v4, 0.0 }
  0xbf   :  { %v211_v56 = vmax.f32 %v174_v55, 0.0  ;;  %300 = vmatmul.f32.vlgmr.msrb.gmra.mxu3 %v220_v6 }
  0xc1   :  { %273 = vmatmul.f32.gmra.mxu1 %v211_v56 }
  0xc2   :  { %v203_v8 = vpop.f32.mrf.mxu3 }
  0xc3   :  { %v204_v10 = vadd.f32 %v401_v36, %v203_v8 }
  0xc4   :  { %v176_v57 = vpop.f32.mrf.mxu0 }
  0xc5   :  { %v177_v59 = vadd.f32 %v401_v36, %v176_v57  ;;  %v221_v12 = vmax.f32 %v204_v10, 0.0 }
  0xc7   :  { %v212_v60 = vmax.f32 %v177_v59, 0.0  ;;  %303 = vmatmul.f32.gmra.mxu3 %v221_v12 }
  0xc9   :  { %276 = vmatmul.f32.gmra.mxu1 %v212_v60 }
  0xcc   :  { %v179_v61 = vpop.f32.mrf.mxu0 }
  0xcd   :  { %v180_v63 = vadd.f32 %v401_v36, %v179_v61 }
  0xcf   :  { %v213_v0 = vmax.f32 %v180_v63, 0.0 }
  0xd1   :  { %279 = vmatmul.f32.vlgmr.msra.gmra.mxu2 %v213_v0 }
  0xd4   :  { %v182_v1 = vpop.f32.mrf.mxu0 }
  0xd5   :  { %v183_v3 = vadd.f32 %v401_v36, %v182_v1 }
  0xd7   :  { %v214_v5 = vmax.f32 %v183_v3, 0.0 }
  0xd9   :  { %282 = vmatmul.f32.gmra.mxu2 %v214_v5 }
  0xdc   :  { %v185_v7 = vpop.f32.mrf.mxu0 }
  0xdd   :  { %v186_v9 = vadd.f32 %v401_v36, %v185_v7 }
  0xdf   :  { %v215_v11 = vmax.f32 %v186_v9, 0.0 }
  0xe1   :  { %285 = vmatmul.f32.gmra.mxu2 %v215_v11 }
  0xe9   :  { %288 = vmatmul.f32.gmra.mxu2 %v216_v14 }
  0xf1   :  { %291 = vmatmul.f32.gmra.mxu2 %v217_v16 }
  0xf9   :  { %294 = vmatmul.f32.gmra.mxu2 %v218_v18 }
 0x101   :  { %297 = vmatmul.f32.gmra.mxu2 %v219_v20 }
 0x116   :  { %v259_v22 = vpop.f32.mrf.mxu1 }
 0x117   :  { %v260_v23 = vadd.f32 %v402_v21, %v259_v22 }
 0x119   :  { %307 = vst [vmem:[#allocation8] sm:$0xff] %v260_v23 }
 0x11e   :  { %v262_v24 = vpop.f32.mrf.mxu1 }
 0x11f   :  { %v263_v25 = vadd.f32 %v402_v21, %v262_v24 }
 0x121   :  { %308 = vst [vmem:[#allocation8 + $0x8] sm:$0xff] %v263_v25 }
 0x126   :  { %v265_v26 = vpop.f32.mrf.mxu1 }
 0x127   :  { %v266_v27 = vadd.f32 %v402_v21, %v265_v26 }
 0x129   :  { %309 = vst [vmem:[#allocation8 + $0x10] sm:$0xff] %v266_v27 }
 0x12e   :  { %v268_v28 = vpop.f32.mrf.mxu1 }
 0x12f   :  { %v269_v29 = vadd.f32 %v402_v21, %v268_v28 }
 0x131   :  { %310 = vst [vmem:[#allocation8 + $0x18] sm:$0xff] %v269_v29 }
 0x136   :  { %v271_v30 = vpop.f32.mrf.mxu1 }
 0x137   :  { %v272_v31 = vadd.f32 %v402_v21, %v271_v30 }
 0x139   :  { %311 = vst [vmem:[#allocation8 + $0x20] sm:$0xff] %v272_v31 }
 0x13e   :  { %v274_v32 = vpop.f32.mrf.mxu1 }
 0x13f   :  { %v275_v33 = vadd.f32 %v402_v21, %v274_v32 }
 0x141   :  { %312 = vst [vmem:[#allocation8 + $0x28] sm:$0xff] %v275_v33 }
 0x142   :  { %v301_v39 = vpop.f32.mrf.mxu3 }
 0x143   :  { %v302_v41 = vadd.f32 %v402_v21, %v301_v39 }
 0x145   :  { %321 = vst [vmem:[#allocation8 + $0x70] sm:$0xff] %v302_v41 }
 0x146   :  { %v277_v34 = vpop.f32.mrf.mxu1 }
 0x147   :  { %v278_v35 = vadd.f32 %v402_v21, %v277_v34 }
 0x149   :  { %313 = vst [vmem:[#allocation8 + $0x30] sm:$0xff] %v278_v35 }
 0x14a   :  { %v304_v43 = vpop.f32.mrf.mxu3 }
 0x14b   :  { %v305_v45 = vadd.f32 %v402_v21, %v304_v43 }
 0x14d   :  { %322 = vst [vmem:[#allocation8 + $0x78] sm:$0xff] %v305_v45 }
 0x154   :  { %v280_v36 = vpop.f32.mrf.mxu2 }
 0x155   :  { %v281_v37 = vadd.f32 %v402_v21, %v280_v36 }
 0x157   :  { %314 = vst [vmem:[#allocation8 + $0x38] sm:$0xff] %v281_v37 }
 0x15c   :  { %v283_v38 = vpop.f32.mrf.mxu2 }
 0x15d   :  { %v284_v40 = vadd.f32 %v402_v21, %v283_v38 }
 0x15f   :  { %315 = vst [vmem:[#allocation8 + $0x40] sm:$0xff] %v284_v40 }
 0x164   :  { %v286_v42 = vpop.f32.mrf.mxu2 }
 0x165   :  { %v287_v44 = vadd.f32 %v402_v21, %v286_v42 }
 0x167   :  { %316 = vst [vmem:[#allocation8 + $0x48] sm:$0xff] %v287_v44 }
 0x16c   :  { %v289_v46 = vpop.f32.mrf.mxu2 }
 0x16d   :  { %v290_v47 = vadd.f32 %v402_v21, %v289_v46 }
 0x16f   :  { %317 = vst [vmem:[#allocation8 + $0x50] sm:$0xff] %v290_v47 }
 0x174   :  { %v292_v48 = vpop.f32.mrf.mxu2 }
 0x175   :  { %v293_v49 = vadd.f32 %v402_v21, %v292_v48 }
 0x177   :  { %318 = vst [vmem:[#allocation8 + $0x58] sm:$0xff] %v293_v49 }
 0x17c   :  { %v295_v50 = vpop.f32.mrf.mxu2 }
 0x17d   :  { %v296_v51 = vadd.f32 %v402_v21, %v295_v50 }
 0x17f   :  { %319 = vst [vmem:[#allocation8 + $0x60] sm:$0xff] %v296_v51 }
 0x184   :  { %v298_v52 = vpop.f32.mrf.mxu2 }
 0x185   :  { %v299_v53 = vadd.f32 %v402_v21, %v298_v52 }
 0x187   :  { %320 = vst [vmem:[#allocation8 + $0x68] sm:$0xff] %v299_v53 }
 0x188   :  { %326 = vsyncadd [#allocation4], 1792  ;;  %s329_s11 = sshll.u32 %s592_s5, 4  ;;  %s510_s12 = smov [#allocation8]   ;;  %s330_s11 = int_to_ptr.hbm [resolvable:$true] %s329_s11 }
 0x189   :  { %s327_s13 = sshll.u32 %s510_s12, 4  ;;  %s328_s13 = int_to_ptr.vmem [resolvable:$true] %s327_s13 }
 0x18a   :  { %335 = dma.vmem_to_hbm [thread:$0]  %s328_s13, 256, %s330_s11, [#allocation4], %s506_s26, %s506_s26, %s507_s27  }
 0x18b   :  { %503 = dma.done.wait [#allocation4], 2048  }
 0x18c   :  { %504 = vsyncadd [#allocation4], 4294965248 }
 0x18d   :  { %340 = vsyncpa [#allocation3], 1 }
 0x18e   :  { %341 = vsyncpa [#allocation6], 1 }
 0x18f   :  { %342 = vsyncpa [#allocation4], 1 }

// kernel: tpu_custom_call.1
= control target key start
LH: loop header
LB: loop body
LE: loop exit
PB: predicated region body
PF: predicated region fallthrough
CT: control target
= control target key end

     0   :  { %10 = vsyncpa [#allocation3], 0  ;;  %s587_s0 = inlined_call_operand.hbm [shape: f32[16,32], index: 0, kind: input, shape index: {}]   ;;  %s588_s1 = inlined_call_operand.hbm [shape: f32[32,128], index: 1, kind: input, shape index: {}]   ;;  %s589_s2 = inlined_call_operand.vmem [shape: f32[1,128], index: 2, kind: input, shape index: {}]   ;;  %s590_s3 = inlined_call_operand.hbm [shape: f32[128,128], index: 3, kind: input, shape index: {}]   ;;  %s591_s4 = inlined_call_operand.vmem [shape: f32[1,128], index: 4, kind: input, shape index: {}]   ;;  %s592_s5 = inlined_call_operand.hbm [shape: f32[16,128], index: 5, kind: output, shape index: {}]  }
   0x1   :  { %11 = vsyncpa [#allocation6], 0 }
   0x2   :  { %12 = vsyncpa [#allocation4], 0 }
   0x3   :  { %16 = vsyncadd [#allocation3], 1792  ;;  %s30_s20 = sshll.u32 %s588_s1, 4  ;;  %s505_s21 = smov [#allocation5]   ;;  %s31_s20 = int_to_ptr.hbm [resolvable:$true] %s30_s20 }
   0x4   :  { %s32_s22 = sshll.u32 %s505_s21, 4  ;;  %s17_s25 = sshll.u32 %s587_s0, 4  ;;  %s33_s22 = int_to_ptr.vmem [resolvable:$true] %s32_s22  ;;  %s18_s25 = int_to_ptr.hbm [resolvable:$true] %s17_s25 }
   0x5   :  { %s506_s26 = smov 128   ;;  %s507_s27 = smov 8  }
   0x6   :  { %38 = dma.hbm_to_vmem [thread:$0]  %s31_s20, 512, %s33_s22, [#allocation6], %s506_s26, %s506_s26, %s507_s27  }
   0x7   :  { %s508_s28 = smov [#allocation2]   ;;  %s45_s1 = sshll.u32 %s590_s3, 4  ;;  %s46_s1 = int_to_ptr.hbm [resolvable:$true] %s45_s1 }
   0x8   :  { %s19_s29 = sshll.u32 %s508_s28, 4  ;;  %s509_s0 = smov [#allocation7]   ;;  %s20_s29 = int_to_ptr.vmem [resolvable:$true] %s19_s29 }
   0x9   :  { %25 = dma.hbm_to_vmem [thread:$0]  %s18_s25, 256, %s20_s29, [#allocation3], %s506_s26, %s506_s26, %s507_s27  }
   0xa   :  { %s47_s7 = sshll.u32 %s509_s0, 4  ;;  %s48_s7 = int_to_ptr.vmem [resolvable:$true] %s47_s7 }
   0xb   :  { %53 = dma.hbm_to_vmem [thread:$0]  %s46_s1, 2048, %s48_s7, [#allocation6], %s506_s26, %s506_s26, %s507_s27  }
   0xc   :  { %499 = dma.done.wait [#allocation3], 2048  }
   0xd   :  { %500 = vsyncadd [#allocation3], 4294965248 }
   0xe   :  { %501 = dma.done.wait [#allocation6], 2560  }
   0xf   :  { %502 = vsyncadd [#allocation6], 4294964736  ;;  %v87_v0 = vld [vmem:[#allocation5 + $0x18] sm:$0xff]  ;;  %v86_v1 = vld [vmem:[#allocation5 + $0x10] sm:$0xff]  ;;  %vm92_vm0 = vcmask 261120  }
  0x10   :  { %153 = vmatpush.msra.mxu0 %v87_v0  ;;  %359 = vmatpush.msra.mxu3 %v87_v0  ;;  %v85_v2 = vld [vmem:[#allocation5 + $0x8] sm:$0xff]  ;;  %v84_v3 = vld [vmem:[#allocation5] sm:$0xff]  ;;  %v70_v6 = vld [vmem:[#allocation2 + $0x10] sm:$0xff] }
  0x11   :  { %v68_v4 = vld [vmem:[#allocation2] sm:$0xff]  ;;  %v69_v5 = vld [vmem:[#allocation2 + $0x8] sm:$0xff]  ;;  %v71_v7 = vld [vmem:[#allocation2 + $0x18] sm:$0xff] }
  0x12   :  { %154 = vmatpush.msra.mxu0 %v86_v1  ;;  %360 = vmatpush.msra.mxu3 %v86_v1  ;;  %v78_v8 = vld [vmem:[#allocation2 + $0x50] sm:$0xff]  ;;  %v72_v9 = vld [vmem:[#allocation2 + $0x20] sm:$0xff]  ;;  %v79_v10 = vld [vmem:[#allocation2 + $0x58] sm:$0xff] }
  0x13   :  { %v73_v11 = vld [vmem:[#allocation2 + $0x28] sm:$0xff]  ;;  %v80_v12 = vld [vmem:[#allocation2 + $0x60] sm:$0xff]  ;;  %v237_v13 = vld [vmem:[#allocation7 + $0x78] sm:$0xff] }
  0x14   :  { %155 = vmatpush.msra.mxu0 %v85_v2  ;;  %361 = vmatpush.msra.mxu3 %v85_v2  ;;  %v236_v14 = vld [vmem:[#allocation7 + $0x70] sm:$0xff]  ;;  %v235_v15 = vld [vmem:[#allocation7 + $0x68] sm:$0xff]  ;;  %v234_v17 = vld [vmem:[#allocation7 + $0x60] sm:$0xff] }
  0x15   :  { %242 = vmatpush.msra.mxu1 %v237_v13  ;;  %363 = vmatpush.msra.mxu2 %v237_v13  ;;  %v74_v16 = vld [vmem:[#allocation2 + $0x30] sm:$0xff]  ;;  %v81_v18 = vld [vmem:[#allocation2 + $0x68] sm:$0xff]  ;;  %v233_v19 = vld [vmem:[#allocation7 + $0x58] sm:$0xff] }
  0x16   :  { %156 = vmatpush.msra.mxu0 %v84_v3  ;;  %362 = vmatpush.msra.mxu3 %v84_v3  ;;  %v232_v20 = vld [vmem:[#allocation7 + $0x50] sm:$0xff]  ;;  %v231_v21 = vld [vmem:[#allocation7 + $0x48] sm:$0xff]  ;;  %v75_v22 = vld [vmem:[#allocation2 + $0x38] sm:$0xff] }
  0x17   :  { %343 = vmatmul.msk.f32.vlgmr.msra.gmra.mxu0 %vm92_vm0, %v68_v4  ;;  %353 = vmatmul.msk.f32.vlgmr.msra.gmra.mxu3 %vm92_vm0, %v78_v8  ;;  %v230_v23 = vld [vmem:[#allocation7 + $0x40] sm:$0xff]  ;;  %v82_v24 = vld [vmem:[#allocation2 + $0x70] sm:$0xff]  ;;  %v229_v25 = vld [vmem:[#allocation7 + $0x38] sm:$0xff] }
  0x18   :  { %364 = vmatpush.msrb.mxu3 %v237_v13  ;;  %243 = vmatpush.msra.mxu1 %v236_v14  ;;  %v228_v26 = vld [vmem:[#allocation7 + $0x30] sm:$0xff]  ;;  %v227_v27 = vld [vmem:[#allocation7 + $0x28] sm:$0xff]  ;;  %v76_v28 = vld [vmem:[#allocation2 + $0x40] sm:$0xff] }
  0x19   :  { %365 = vmatpush.msra.mxu2 %v236_v14  ;;  %v226_v29 = vld [vmem:[#allocation7 + $0x20] sm:$0xff]  ;;  %v83_v30 = vld [vmem:[#allocation2 + $0x78] sm:$0xff]  ;;  %v77_v32 = vld [vmem:[#allocation2 + $0x48] sm:$0xff] }
  0x1a   :  { %366 = vmatpush.msrb.mxu3 %v236_v14  ;;  %244 = vmatpush.msra.mxu1 %v235_v15  ;;  %v225_v31 = vld [vmem:[#allocation7 + $0x18] sm:$0xff]  ;;  %v224_v33 = vld [vmem:[#allocation7 + $0x10] sm:$0xff]  ;;  %v223_v34 = vld [vmem:[#allocation7 + $0x8] sm:$0xff] }
  0x1b   :  { %367 = vmatpush.msra.mxu2 %v235_v15  ;;  %v222_v35 = vld [vmem:[#allocation7] sm:$0xff] }
  0x1c   :  { %368 = vmatpush.msrb.mxu3 %v235_v15  ;;  %245 = vmatpush.msra.mxu1 %v234_v17  ;;  %v401_v36 = vld [vmem:[%s589_s2] ss:$0 sm:$0xff] }
  0x1d   :  { %369 = vmatpush.msra.mxu2 %v234_v17 }
  0x1e   :  { %246 = vmatpush.msra.mxu1 %v233_v19  ;;  %370 = vmatpush.msrb.mxu3 %v234_v17 }
  0x1f   :  { %344 = vmatmul.msk.f32.gmra.mxu0 %vm92_vm0, %v69_v5  ;;  %354 = vmatmul.msk.f32.gmra.mxu3 %vm92_vm0, %v79_v10 }
  0x20   :  { %371 = vmatpush.msra.mxu2 %v233_v19  ;;  %247 = vmatpush.msra.mxu1 %v232_v20 }
  0x21   :  { %372 = vmatpush.msrb.mxu3 %v233_v19 }
  0x22   :  { %373 = vmatpush.msra.mxu2 %v232_v20  ;;  %248 = vmatpush.msra.mxu1 %v231_v21 }
  0x23   :  { %374 = vmatpush.msrb.mxu3 %v232_v20 }
  0x24   :  { %375 = vmatpush.msra.mxu2 %v231_v21  ;;  %249 = vmatpush.msra.mxu1 %v230_v23 }
  0x25   :  { %376 = vmatpush.msrb.mxu3 %v231_v21  ;;  %v402_v21 = vld [vmem:[%s591_s4] ss:$0 sm:$0xff] }
  0x26   :  { %377 = vmatpush.msra.mxu2 %v230_v23  ;;  %250 = vmatpush.msra.mxu1 %v229_v25 }
  0x27   :  { %345 = vmatmul.msk.f32.gmra.mxu0 %vm92_vm0, %v70_v6  ;;  %355 = vmatmul.msk.f32.gmra.mxu3 %vm92_vm0, %v80_v12 }
  0x28   :  { %379 = vmatpush.msra.mxu2 %v229_v25  ;;  %251 = vmatpush.msra.mxu1 %v228_v26 }
  0x29   :  { %378 = vmatpush.msrb.mxu3 %v230_v23 }
  0x2a   :  { %381 = vmatpush.msra.mxu2 %v228_v26  ;;  %252 = vmatpush.msra.mxu1 %v227_v27 }
  0x2b   :  { %380 = vmatpush.msrb.mxu3 %v229_v25 }
  0x2c   :  { %383 = vmatpush.msra.mxu2 %v227_v27  ;;  %253 = vmatpush.msra.mxu1 %v226_v29 }
  0x2d   :  { %382 = vmatpush.msrb.mxu3 %v228_v26 }
  0x2e   :  { %385 = vmatpush.msra.mxu2 %v226_v29  ;;  %254 = vmatpush.msra.mxu1 %v225_v31 }
  0x2f   :  { %346 = vmatmul.msk.f32.gmra.mxu0 %vm92_vm0, %v71_v7  ;;  %356 = vmatmul.msk.f32.gmra.mxu3 %vm92_vm0, %v81_v18 }
  0x30   :  { %387 = vmatpush.msra.mxu2 %v225_v31  ;;  %384 = vmatpush.msrb.mxu3 %v227_v27 }
  0x31   :  { %255 = vmatpush.msra.mxu1 %v224_v33 }
  0x32   :  { %386 = vmatpush.msrb.mxu3 %v226_v29  ;;  %389 = vmatpush.msra.mxu2 %v224_v33 }
  0x33   :  { %256 = vmatpush.msra.mxu1 %v223_v34 }
  0x34   :  { %388 = vmatpush.msrb.mxu3 %v225_v31  ;;  %391 = vmatpush.msra.mxu2 %v223_v34 }
  0x35   :  { %257 = vmatpush.msra.mxu1 %v222_v35 }
  0x36   :  { %390 = vmatpush.msrb.mxu3 %v224_v33  ;;  %393 = vmatpush.msra.mxu2 %v222_v35 }
  0x37   :  { %347 = vmatmul.msk.f32.gmra.mxu0 %vm92_vm0, %v72_v9  ;;  %357 = vmatmul.msk.f32.gmra.mxu3 %vm92_vm0, %v82_v24 }
  0x38   :  { %392 = vmatpush.msrb.mxu3 %v223_v34 }
  0x3a   :  { %394 = vmatpush.msrb.mxu3 %v222_v35 }
  0x3f   :  { %348 = vmatmul.msk.f32.gmra.mxu0 %vm92_vm0, %v73_v11  ;;  %358 = vmatmul.msk.f32.gmra.mxu3 %vm92_vm0, %v83_v30 }
  0x47   :  { %349 = vmatmul.msk.f32.gmra.mxu0 %vm92_vm0, %v74_v16 }
  0x4f   :  { %350 = vmatmul.msk.f32.gmra.mxu0 %vm92_vm0, %v75_v22 }
  0x57   :  { %351 = vmatmul.msk.f32.gmra.mxu0 %vm92_vm0, %v76_v28 }
  0x5f   :  { %352 = vmatmul.msk.f32.gmra.mxu0 %vm92_vm0, %v77_v32 }
  0x94   :  { %v158_v37 = vpop.f32.mrf.mxu0 }
  0x95   :  { %v159_v38 = vadd.f32 %v401_v36, %v158_v37 }
  0x97   :  { %v206_v39 = vmax.f32 %v159_v38, 0.0 }
  0x99   :  { %258 = vmatmul.f32.vlgmr.msra.gmra.mxu1 %v206_v39 }
  0x9a   :  { %v188_v50 = vpop.f32.mrf.mxu3 }
  0x9b   :  { %v189_v13 = vadd.f32 %v401_v36, %v188_v50 }
  0x9c   :  { %v161_v40 = vpop.f32.mrf.mxu0 }
  0x9d   :  { %v162_v41 = vadd.f32 %v401_v36, %v161_v40  ;;  %v216_v14 = vmax.f32 %v189_v13, 0.0 }
  0x9f   :  { %v207_v42 = vmax.f32 %v162_v41, 0.0 }
  0xa1   :  { %261 = vmatmul.f32.gmra.mxu1 %v207_v42 }
  0xa2   :  { %v191_v54 = vpop.f32.mrf.mxu3 }
  0xa3   :  { %v192_v15 = vadd.f32 %v401_v36, %v191_v54 }
  0xa4   :  { %v164_v43 = vpop.f32.mrf.mxu0 }
  0xa5   :  { %v165_v44 = vadd.f32 %v401_v36, %v164_v43  ;;  %v217_v16 = vmax.f32 %v192_v15, 0.0 }
  0xa7   :  { %v208_v45 = vmax.f32 %v165_v44, 0.0 }
  0xa9   :  { %264 = vmatmul.f32.gmra.mxu1 %v208_v45 }
  0xaa   :  { %v194_v58 = vpop.f32.mrf.mxu3 }
  0xab   :  { %v195_v17 = vadd.f32 %v401_v36, %v194_v58 }
  0xac   :  { %v167_v46 = vpop.f32.mrf.mxu0 }
  0xad   :  { %v168_v47 = vadd.f32 %v401_v36, %v167_v46  ;;  %v218_v18 = vmax.f32 %v195_v17, 0.0 }
  0xaf   :  { %v209_v48 = vmax.f32 %v168_v47, 0.0 }
  0xb1   :  { %267 = vmatmul.f32.gmra.mxu1 %v209_v48 }
  0xb2   :  { %v197_v62 = vpop.f32.mrf.mxu3 }
  0xb3   :  { %v198_v19 = vadd.f32 %v401_v36, %v197_v62 }
  0xb4   :  { %v170_v49 = vpop.f32.mrf.mxu0 }
  0xb5   :  { %v171_v51 = vadd.f32 %v401_v36, %v170_v49  ;;  %v219_v20 = vmax.f32 %v198_v19, 0.0 }
  0xb7   :  { %v210_v52 = vmax.f32 %v171_v51, 0.0 }
  0xb9   :  { %270 = vmatmul.f32.gmra.mxu1 %v210_v52 }
  0xba   :  { %v200_v2 = vpop.f32.mrf.mxu3 }
  0xbb   :  { %v201_v4 = vadd.f32 %v401_v36, %v200_v2 }
  0xbc   :  { %v173_v53 = vpop.f32.mrf.mxu0 }
  0xbd   :  { %v174_v55 = vadd.f32 %v401_v36, %v173_v53  ;;  %v220_v6 = vmax.f32 %v201_v4, 0.0 }
  0xbf   :  { %v211_v56 = vmax.f32 %v174_v55, 0.0  ;;  %300 = vmatmul.f32.vlgmr.msrb.gmra.mxu3 %v220_v6 }
  0xc1   :  { %273 = vmatmul.f32.gmra.mxu1 %v211_v56 }
  0xc2   :  { %v203_v8 = vpop.f32.mrf.mxu3 }
  0xc3   :  { %v204_v10 = vadd.f32 %v401_v36, %v203_v8 }
  0xc4   :  { %v176_v57 = vpop.f32.mrf.mxu0 }
  0xc5   :  { %v177_v59 = vadd.f32 %v401_v36, %v176_v57  ;;  %v221_v12 = vmax.f32 %v204_v10, 0.0 }
  0xc7   :  { %v212_v60 = vmax.f32 %v177_v59, 0.0  ;;  %303 = vmatmul.f32.gmra.mxu3 %v221_v12 }
  0xc9   :  { %276 = vmatmul.f32.gmra.mxu1 %v212_v60 }
  0xcc   :  { %v179_v61 = vpop.f32.mrf.mxu0 }
  0xcd   :  { %v180_v63 = vadd.f32 %v401_v36, %v179_v61 }
  0xcf   :  { %v213_v0 = vmax.f32 %v180_v63, 0.0 }
  0xd1   :  { %279 = vmatmul.f32.vlgmr.msra.gmra.mxu2 %v213_v0 }
  0xd4   :  { %v182_v1 = vpop.f32.mrf.mxu0 }
  0xd5   :  { %v183_v3 = vadd.f32 %v401_v36, %v182_v1 }
  0xd7   :  { %v214_v5 = vmax.f32 %v183_v3, 0.0 }
  0xd9   :  { %282 = vmatmul.f32.gmra.mxu2 %v214_v5 }
  0xdc   :  { %v185_v7 = vpop.f32.mrf.mxu0 }
  0xdd   :  { %v186_v9 = vadd.f32 %v401_v36, %v185_v7 }
  0xdf   :  { %v215_v11 = vmax.f32 %v186_v9, 0.0 }
  0xe1   :  { %285 = vmatmul.f32.gmra.mxu2 %v215_v11 }
  0xe9   :  { %288 = vmatmul.f32.gmra.mxu2 %v216_v14 }
  0xf1   :  { %291 = vmatmul.f32.gmra.mxu2 %v217_v16 }
  0xf9   :  { %294 = vmatmul.f32.gmra.mxu2 %v218_v18 }
 0x101   :  { %297 = vmatmul.f32.gmra.mxu2 %v219_v20 }
 0x116   :  { %v259_v22 = vpop.f32.mrf.mxu1 }
 0x117   :  { %v260_v23 = vadd.f32 %v402_v21, %v259_v22 }
 0x119   :  { %307 = vst [vmem:[#allocation8] sm:$0xff] %v260_v23 }
 0x11e   :  { %v262_v24 = vpop.f32.mrf.mxu1 }
 0x11f   :  { %v263_v25 = vadd.f32 %v402_v21, %v262_v24 }
 0x121   :  { %308 = vst [vmem:[#allocation8 + $0x8] sm:$0xff] %v263_v25 }
 0x126   :  { %v265_v26 = vpop.f32.mrf.mxu1 }
 0x127   :  { %v266_v27 = vadd.f32 %v402_v21, %v265_v26 }
 0x129   :  { %309 = vst [vmem:[#allocation8 + $0x10] sm:$0xff] %v266_v27 }
 0x12e   :  { %v268_v28 = vpop.f32.mrf.mxu1 }
 0x12f   :  { %v269_v29 = vadd.f32 %v402_v21, %v268_v28 }
 0x131   :  { %310 = vst [vmem:[#allocation8 + $0x18] sm:$0xff] %v269_v29 }
 0x136   :  { %v271_v30 = vpop.f32.mrf.mxu1 }
 0x137   :  { %v272_v31 = vadd.f32 %v402_v21, %v271_v30 }
 0x139   :  { %311 = vst [vmem:[#allocation8 + $0x20] sm:$0xff] %v272_v31 }
 0x13e   :  { %v274_v32 = vpop.f32.mrf.mxu1 }
 0x13f   :  { %v275_v33 = vadd.f32 %v402_v21, %v274_v32 }
 0x141   :  { %312 = vst [vmem:[#allocation8 + $0x28] sm:$0xff] %v275_v33 }
 0x142   :  { %v301_v39 = vpop.f32.mrf.mxu3 }
 0x143   :  { %v302_v41 = vadd.f32 %v402_v21, %v301_v39 }
 0x145   :  { %321 = vst [vmem:[#allocation8 + $0x70] sm:$0xff] %v302_v41 }
 0x146   :  { %v277_v34 = vpop.f32.mrf.mxu1 }
 0x147   :  { %v278_v35 = vadd.f32 %v402_v21, %v277_v34 }
 0x149   :  { %313 = vst [vmem:[#allocation8 + $0x30] sm:$0xff] %v278_v35 }
 0x14a   :  { %v304_v43 = vpop.f32.mrf.mxu3 }
 0x14b   :  { %v305_v45 = vadd.f32 %v402_v21, %v304_v43 }
 0x14d   :  { %322 = vst [vmem:[#allocation8 + $0x78] sm:$0xff] %v305_v45 }
 0x154   :  { %v280_v36 = vpop.f32.mrf.mxu2 }
 0x155   :  { %v281_v37 = vadd.f32 %v402_v21, %v280_v36 }
 0x157   :  { %314 = vst [vmem:[#allocation8 + $0x38] sm:$0xff] %v281_v37 }
 0x15c   :  { %v283_v38 = vpop.f32.mrf.mxu2 }
 0x15d   :  { %v284_v40 = vadd.f32 %v402_v21, %v283_v38 }
 0x15f   :  { %315 = vst [vmem:[#allocation8 + $0x40] sm:$0xff] %v284_v40 }
 0x164   :  { %v286_v42 = vpop.f32.mrf.mxu2 }
 0x165   :  { %v287_v44 = vadd.f32 %v402_v21, %v286_v42 }
 0x167   :  { %316 = vst [vmem:[#allocation8 + $0x48] sm:$0xff] %v287_v44 }
 0x16c   :  { %v289_v46 = vpop.f32.mrf.mxu2 }
 0x16d   :  { %v290_v47 = vadd.f32 %v402_v21, %v289_v46 }
 0x16f   :  { %317 = vst [vmem:[#allocation8 + $0x50] sm:$0xff] %v290_v47 }
 0x174   :  { %v292_v48 = vpop.f32.mrf.mxu2 }
 0x175   :  { %v293_v49 = vadd.f32 %v402_v21, %v292_v48 }
 0x177   :  { %318 = vst [vmem:[#allocation8 + $0x58] sm:$0xff] %v293_v49 }
 0x17c   :  { %v295_v50 = vpop.f32.mrf.mxu2 }
 0x17d   :  { %v296_v51 = vadd.f32 %v402_v21, %v295_v50 }
 0x17f   :  { %319 = vst [vmem:[#allocation8 + $0x60] sm:$0xff] %v296_v51 }
 0x184   :  { %v298_v52 = vpop.f32.mrf.mxu2 }
 0x185   :  { %v299_v53 = vadd.f32 %v402_v21, %v298_v52 }
 0x187   :  { %320 = vst [vmem:[#allocation8 + $0x68] sm:$0xff] %v299_v53 }
 0x188   :  { %326 = vsyncadd [#allocation4], 1792  ;;  %s329_s11 = sshll.u32 %s592_s5, 4  ;;  %s510_s12 = smov [#allocation8]   ;;  %s330_s11 = int_to_ptr.hbm [resolvable:$true] %s329_s11 }
 0x189   :  { %s327_s13 = sshll.u32 %s510_s12, 4  ;;  %s328_s13 = int_to_ptr.vmem [resolvable:$true] %s327_s13 }
 0x18a   :  { %335 = dma.vmem_to_hbm [thread:$0]  %s328_s13, 256, %s330_s11, [#allocation4], %s506_s26, %s506_s26, %s507_s27  }
 0x18b   :  { %503 = dma.done.wait [#allocation4], 2048  }
 0x18c   :  { %504 = vsyncadd [#allocation4], 4294965248 }
 0x18d   :  { %340 = vsyncpa [#allocation3], 1 }
 0x18e   :  { %341 = vsyncpa [#allocation6], 1 }
 0x18f   :  { %342 = vsyncpa [#allocation4], 1 }

</bundles_post_ra>
